<compile_context>
chip_gen: v7x
topology: tpu7x:2x2x1
jax: 0.10.0
libtpu: 0.0.40
codegen_flags: <defaults>
</compile_context>

<pallas_src>
import jax
import jax.numpy as jnp
from jax.experimental import pallas as pl
from jax.experimental.pallas import tpu as pltpu

SUBLANE = 8  # vreg sublane count


def _round_up(x, m):
    return (x + m - 1) // m * m


def _linear_kernel(x_ref, w_ref, b_ref, o_ref):
    # MXU matmul with f32 accumulation + VPU broadcasted bias add.
    acc = jnp.dot(x_ref[...], w_ref[...], preferred_element_type=jnp.float32)
    o_ref[...] = (acc + b_ref[...]).astype(o_ref.dtype)


def make_simple_policy_params(obs_dim, action_dim, dtype=jnp.float32):
    # Deterministic init, exactly matching the PyTorch module's __init__:
    #   weight.fill_(0.0), bias.fill_(1.0)
    w = jnp.zeros((action_dim, obs_dim), dtype=dtype)  # PyTorch layout (out, in)
    b = jnp.ones((action_dim,), dtype=dtype)
    return w, b


def prepare_params_for_tpu(weight, bias):
    """One-time prep: transpose to (obs_dim, action_dim), bias to a row vector.

    No lane padding -- the output is written unpadded (action_dim == full array
    dim satisfies the TPU block-shape rule).
    """
    return weight.T, bias.reshape(1, -1)


def simple_policy_forward(x, w_t, bias_row, *, block_b=2048,
                          compute_dtype=None, min_pallas_batch=1024):
    """y = x @ W.T + b.

    x: (B, obs_dim); w_t: (obs_dim, action_dim); bias_row: (1, action_dim).

    compute_dtype: optionally cast x / w to bf16 (recommended on v5e; halves
    the dominant activation read traffic). Accumulation stays f32.
    """
    B, K = x.shape
    Kw, N = w_t.shape
    assert K == Kw, (K, Kw)
    out_dtype = bias_row.dtype

    # Small-batch fast path: pallas_call launch + DMA setup dwarfs the work;
    # XLA fuses this trivially.
    if B < min_pallas_batch:
        y = jnp.dot(x, w_t, preferred_element_type=jnp.float32) + bias_row
        return y.astype(out_dtype)

    if compute_dtype is not None:
        x = x.astype(compute_dtype)
        w_t = w_t.astype(compute_dtype)
    # TODO(synk): auto-select compute_dtype=bf16 on v5e via pltpu.get_tpu_info().

    # Batch tile: multiple of 8 sublanes, capped at block_b, and also capped at
    # ceil(B/2) so the grid has >=2 steps whenever B > 8 (keeps v7x's second
    # TensorCore busy). Double-buffered 2048x32 f32 x tiles + narrow out tiles
    # stay far under the scoped-VMEM default on every generation.
    block_b = max(SUBLANE, _round_up(block_b, SUBLANE))
    tb = min(block_b, max(SUBLANE, _round_up(pl.cdiv(B, 2), SUBLANE)))
    grid = (pl.cdiv(B, tb),)

    in_itemsize = jnp.dtype(x.dtype).itemsize
    out_itemsize = jnp.dtype(out_dtype).itemsize
    cost = pl.CostEstimate(
        flops=2 * B * K * N,
        transcendentals=0,
        bytes_accessed=(B * K * in_itemsize
                        + K * N * in_itemsize
                        + N * out_itemsize
                        + B * N * out_itemsize),
    )

    return pl.pallas_call(
        _linear_kernel,
        out_shape=jax.ShapeDtypeStruct((B, N), out_dtype),
        grid_spec=pl.GridSpec(
            grid=grid,
            in_specs=[
                pl.BlockSpec((tb, K), lambda i: (i, 0)),   # x tile (pipelined)
                pl.BlockSpec((K, N), lambda i: (0, 0)),    # resident weight
                pl.BlockSpec((1, N), lambda i: (0, 0)),    # resident bias
            ],
            out_specs=pl.BlockSpec((tb, N), lambda i: (i, 0)),
        ),
        compiler_params=pltpu.CompilerParams(
            dimension_semantics=("parallel",)),
        cost_estimate=cost,
    )(x, w_t, bias_row)


if __name__ == "__main__":
    obs_dim, action_dim = 32, 8

    key = jax.random.PRNGKey(0)
    k_x, k_x2, k_w = jax.random.split(key, 3)

    # Module-spec params: weight = 0, bias = 1.
    w, b = make_simple_policy_params(obs_dim, action_dim)
    w_t, bias_row = prepare_params_for_tpu(w, b)

    # --- Pallas path, exact-multiple batch (2 grid steps) ---
    batch = 16
    x = jax.random.normal(k_x, (batch, obs_dim), dtype=jnp.float32)
    y = simple_policy_forward(x, w_t, bias_row, min_pallas_batch=0)
    y = jax.block_until_ready(y)
    y_ref = x @ w.T + b
    assert y.shape == (batch, action_dim), y.shape
    assert jnp.allclose(y, y_ref, atol=1e-6), "mismatch vs reference (B=16)"
    assert jnp.allclose(y, jnp.ones_like(y), atol=1e-6), "expected all ones"

    # --- Pallas path, ragged batch (partial last block, no wrapper pad) ---
    batch2 = 13
    x2 = jax.random.normal(k_x2, (batch2, obs_dim), dtype=jnp.float32)
    # Use a non-trivial weight here to validate the general linear kernel.
    w_rand = jax.random.normal(k_w, (action_dim, obs_dim), dtype=jnp.float32)
    w_t2, bias_row2 = prepare_params_for_tpu(w_rand, b)
    y2 = simple_policy_forward(x2, w_t2, bias_row2, min_pallas_batch=0)
    y2 = jax.block_until_ready(y2)
    y2_ref = x2 @ w_rand.T + b
    assert y2.shape == (batch2, action_dim), y2.shape
    assert jnp.allclose(y2, y2_ref, atol=1e-4), "mismatch vs reference (B=13)"

    # --- Small-batch fast path (no pallas_call) still matches ---
    y3 = simple_policy_forward(x, w_t, bias_row)  # default min_pallas_batch
    y3 = jax.block_until_ready(y3)
    assert jnp.allclose(y3, y_ref, atol=1e-6), "fast path mismatch"

    print("KERNEL_OK")
</pallas_src>

<mosaic_0001>
module attributes {stable_mosaic.version = 11 : i64} {
  func.func @_linear_kernel(%arg0: i32, %arg1: memref<8x32xf32, #tpu.memory_space<vmem>>, %arg2: memref<32x8xf32, #tpu.memory_space<vmem>>, %arg3: memref<1x8xf32, #tpu.memory_space<vmem>>, %arg4: memref<8x8xf32, #tpu.memory_space<vmem>>) attributes {dimension_semantics = [#tpu.dimension_semantics<parallel>], iteration_bounds = array<i64: 2>, scalar_prefetch = 0 : i64, scratch_operands = 0 : i64, tpu.core_type = #tpu.core_type<tc>, window_params = [{transform_indices = @transform_0, window_bounds = array<i64: 8, 32>}, {pipeline_mode = #tpu.pipeline_mode<synchronous>, transform_indices = @transform_1, window_bounds = array<i64: 32, 8>}, {pipeline_mode = #tpu.pipeline_mode<synchronous>, transform_indices = @transform_2, window_bounds = array<i64: 1, 8>}, {transform_indices = @transform_3, window_bounds = array<i64: 8, 8>}]} {
    %c0 = arith.constant 0 : index
    %c0_0 = arith.constant 0 : index
    %0 = vector.load %arg1[%c0, %c0_0] : memref<8x32xf32, #tpu.memory_space<vmem>>, vector<8x32xf32>
    %c0_1 = arith.constant 0 : index
    %c0_2 = arith.constant 0 : index
    %1 = vector.load %arg2[%c0_1, %c0_2] : memref<32x8xf32, #tpu.memory_space<vmem>>, vector<32x8xf32>
    %cst = arith.constant dense<0.000000e+00> : vector<8x8xf32>
    %2 = tpu.matmul %0, %1, %cst {dimension_numbers = #tpu.dot_dimension_numbers<[1], [0], [0], [1], [0, 0, 1, 1], [], []>} : vector<8x32xf32>, vector<32x8xf32>, vector<8x8xf32> -> vector<8x8xf32>
    %c0_3 = arith.constant 0 : index
    %c0_4 = arith.constant 0 : index
    %3 = vector.load %arg3[%c0_3, %c0_4] : memref<1x8xf32, #tpu.memory_space<vmem>>, vector<1x8xf32>
    %4 = vector.broadcast %3 : vector<1x8xf32> to vector<8x8xf32>
    %5 = arith.addf %2, %4 : vector<8x8xf32>
    %c0_5 = arith.constant 0 : index
    %c0_6 = arith.constant 0 : index
    %6 = vector.load %arg4[%c0_5, %c0_6] : memref<8x8xf32, #tpu.memory_space<vmem>>, vector<8x8xf32>
    tpu.vector_store %arg4[%c0_5, %c0_6], %5 {strides = array<i32>} : memref<8x8xf32, #tpu.memory_space<vmem>>, vector<8x8xf32>,
    return
  }
  func.func @transform_0(%arg0: i32) -> (i32, i32) {
    %c0_i32 = arith.constant 0 : i32
    %c0_i32_0 = arith.constant 0 : i32
    return %arg0, %c0_i32 : i32, i32
  }
  func.func @transform_1(%arg0: i32) -> (i32, i32) {
    %c0_i32 = arith.constant 0 : i32
    %c0_i32_0 = arith.constant 0 : i32
    %c0_i32_1 = arith.constant 0 : i32
    return %c0_i32, %c0_i32_0 : i32, i32
  }
  func.func @transform_2(%arg0: i32) -> (i32, i32) {
    %c0_i32 = arith.constant 0 : i32
    %c0_i32_0 = arith.constant 0 : i32
    %c0_i32_1 = arith.constant 0 : i32
    return %c0_i32, %c0_i32_0 : i32, i32
  }
  func.func @transform_3(%arg0: i32) -> (i32, i32) {
    %c0_i32 = arith.constant 0 : i32
    %c0_i32_0 = arith.constant 0 : i32
    return %arg0, %c0_i32 : i32, i32
  }
}

</mosaic_0001>

<bundles_post_ra>
// kernel: tpu_custom_call.1
= control target key start
LH: loop header
LB: loop body
LE: loop exit
PB: predicated region body
PF: predicated region fallthrough
CT: control target
= control target key end

     0   :  { %s382_s12 = smov 0   ;;  %s414_s0 = inlined_call_operand.vmem [shape: f32[16,32], index: 0, kind: input, shape index: {}]   ;;  %s415_s1 = inlined_call_operand.vmem [shape: f32[32,8], index: 1, kind: input, shape index: {}]   ;;  %s416_s2 = inlined_call_operand.vmem [shape: f32[1,8], index: 2, kind: input, shape index: {}]   ;;  %s417_s3 = inlined_call_operand.vmem [shape: f32[16,8], index: 3, kind: output, shape index: {}]  }
   0x1 LB: > { %s307_s13 = sadd.s32 4294967295, %s357_s12   ;;  %p311_p0 = scmp.ge.s32.totalorder %s357_s12, 1  ;;  %s357_s12 = sphi %s382_s12, %s13_s12  }
   0x2   : > { %p136_p1 = scmp.lt.s32.totalorder %s357_s12, 3 }
   0x4   : > { %p137_p2 = pnand %p311_p0, %p136_p1 }
   0x5   : > { %v167_v0 = vld [vmem:[%s415_s1] sm:$0xff] (!%p137_p2)  ;;  %v168_v1 = vld [vmem:[%s415_s1 + $0x8] sm:$0xff] (!%p137_p2)  ;;  %v169_v2 = vld [vmem:[%s415_s1 + $0x10] sm:$0xff] (!%p137_p2)  ;;  %v359_v3 = vmov (!%p137_p2), 0.0|0.0   ;;  %vm360_vm0 = vmmov (!%p137_p2), 0   ;;  %v361_v6 = vmov (!%p137_p2), 0.0  }
   0x6   : > { %140 = sbr.rel (%p137_p2) target bundleno = 232 (0xe8), region = 32  ;;  %334 = vmatprep.subr.bf16.mxu0 (!%p137_p2), %v359_v3  ;;  %v335_v4 = vpack.c.bf16 (!%p137_p2), %v168_v1, %v167_v0  ;;  %v170_v5 = vld [vmem:[%s415_s1 + $0x18] sm:$0xff] (!%p137_p2)  ;;  %331 = vmatprep.mubr.msk.f32.mxu0 (!%p137_p2), %vm360_vm0, %v361_v6  ;;  %p158_p3 = scmp.lt.s32.totalorder (!%p137_p2), %s307_s13, 1  ;;  %vm178_vm1 = vcmask (!%p137_p2), 261120   ;;  %v314_v9 = vld [vmem:[%s416_s2] ss:$0 sm:$0xff] (!%p137_p2) }
   0x7   : > { %v338_v7 = vpack.c.bf16 (!%p137_p2), %v170_v5, %v169_v2  ;;  %vm252_vm2 = vcmask (!%p137_p2), 64512  }
   0x8   : > { %336 = vmatpush3.bf16.msra.mxu0 (!%p137_p2), %v335_v4 }
   0x9   : > { %337 = vmatprep.subr.bf16.mxu0 (!%p137_p2), %v359_v3 }
   0xc   : > { %339 = vmatpush3.bf16.msra.mxu0 (!%p137_p2), %v338_v7 }
   0xd   : > { %s419_s13 = smov (!%p158_p3, %s307_s13), 1 }
   0xe   : > { %s312_s22 = sshll.u32 %s419_s13, 3 }
   0xf   : > { %s161_s25 = scalar_lea.vmem %s414_s0, %s312_s22  ;;  %s165_s30 = scalar_lea.vmem %s417_s3, %s312_s22 }
  0x10   : > { %v166_v8 = vld [vmem:[%s161_s25] sm:$0xff] }
  0x11   : > { %332 = vmatmul.mubr.msk.f32.vlgmr.msra.gmra.mrb[0].mxu0 %vm178_vm1, %v166_v8 }
  0xe4   : > { %v248_v10 = vpop.f32.mrb[0].mxu0 }
  0xe5   : > { %v249_v11 = vadd.f32 %v314_v9, %v248_v10  ;;  %v333_v12 = vpop.f32.mrb[1].mxu0 }
  0xe7   : > { %253 = vst.msk [vmem:[%s165_s30] sm:$0xff] %vm252_vm2, %v249_v11 }
  0xe8 PF: > { %s13_s12 = sadd.s32 1, %s357_s12  }
  0xe9   : > { %p10_p4 = scmp.ge.s32.totalorder %s13_s12, 4  }
  0xeb   :  { %12 = sbr.rel (!%p10_p4) target bundleno = 1 (0x1), region = 62 }

</bundles_post_ra>
